<compile_context>
chip_gen: v7x
topology: tpu7x:2x2x1
jax: 0.10.0
libtpu: 0.0.40
codegen_flags: <defaults>
</compile_context>

<pallas_src>
import functools

import jax
import jax.numpy as jnp
from jax.experimental import pallas as pl
from jax.experimental.pallas import tpu as pltpu

_MIB = 1024 * 1024
# ~2 MiB input blocks: streaming reduces hit ~85% of HBM roofline by 1-4 MiB
# blocks (per-step overhead ~0.35us); small blocks keep the pipeline deep and
# leave VMEM headroom on v7x (64 MiB / TensorCore).
_DEFAULT_BLOCK_BUDGET = 2 * _MIB


def _cdiv(a, b):
    return -(-a // b)


def _round_up(a, b):
    return _cdiv(a, b) * b


def _sublanes(dtype):
    """Sublanes per vreg for dtype: 8 (f32/i32), 16 (bf16/f16), 32 (int8/fp8)."""
    return max(8, 32 // jnp.dtype(dtype).itemsize)


def _fill_values(dtype):
    """(min-identity, max-identity) fill values used for masking / init."""
    if jnp.issubdtype(dtype, jnp.floating):
        if jnp.dtype(dtype).itemsize >= 2:        # f32 / bf16 / f16 have +/-inf
            return float("inf"), float("-inf")
        fi = jnp.finfo(dtype)                     # fp8 variants: finite identities
        return float(fi.max), float(fi.min)
    ii = jnp.iinfo(dtype)
    return int(ii.max), int(ii.min)


def _vmem_limit(block_bytes):
    # Main paths use <=2 MiB blocks -> default-ish scoped VMEM; only raise it
    # (bounded, v7x-safe) if a corner path ended up with a big block.
    return int(max(32 * _MIB, min(2 * block_bytes + 8 * _MIB, 56 * _MIB)))


# ---------------------------------------------------------------------------
# Kernels
# ---------------------------------------------------------------------------
def _minmax_c_packed_kernel(x_ref, min_ref, max_ref, *,
                            acc_rows, g_total, tile_g, needs_mask):
    """Per-row running min/max into a lane-dense (tile_i, acc_rows, 128) slab.

    Input block: (tile_i, tile_g, 128) of the (rows, gp, 128) view.  The block
    is reduced with elementwise (VPU) min/max across the tile_g/acc_rows axis;
    no cross-lane (XLU) work happens in the kernel.
    """
    k = pl.program_id(1)
    dt = x_ref.dtype
    hi, lo = _fill_values(dt)
    hi = jnp.asarray(hi, dt)
    lo = jnp.asarray(lo, dt)
    ti = x_ref.shape[0]
    kg = tile_g // acc_rows

    def _update(x_min, x_max):
        rmin = jnp.min(x_min.reshape(ti, kg, acc_rows, 128), axis=1)
        rmax = jnp.max(x_max.reshape(ti, kg, acc_rows, 128), axis=1)
        # Fold the k==0 init into a select (no extra store + re-read).
        prev_min = jnp.where(k == 0, hi, min_ref[...])
        prev_max = jnp.where(k == 0, lo, max_ref[...])
        min_ref[...] = jnp.minimum(prev_min, rmin)
        max_ref[...] = jnp.maximum(prev_max, rmax)

    if needs_mask:
        last = pl.num_programs(1) - 1

        @pl.when(k != last)
        def _():
            x = x_ref[...]
            _update(x, x)

        @pl.when(k == last)
        def _():
            x = x_ref[...]
            gidx = jax.lax.broadcasted_iota(jnp.int32, x.shape, 1) + k * tile_g
            valid = gidx < g_total
            _update(jnp.where(valid, x, hi), jnp.where(valid, x, lo))
    else:
        x = x_ref[...]
        _update(x, x)
    # NOTE: when n % tile_i != 0, the padded rows of the last i-block reduce
    # garbage data; this is benign because rows are independent and Pallas drops
    # the out-of-bounds part of the output block on writeback.


def _minmax_l_packed_kernel(x_ref, min_ref, max_ref, *,
                            acc_rows, r_total, tile_r, needs_mask):
    """Global min/max partial: each step writes its own lane-dense (acc_rows,128)
    slab (unmasked vst); folding happens in the wrapper."""
    k = pl.program_id(0)
    dt = x_ref.dtype
    hi, lo = _fill_values(dt)
    hi = jnp.asarray(hi, dt)
    lo = jnp.asarray(lo, dt)
    kg = tile_r // acc_rows

    def _emit(x_min, x_max):
        rmin = jnp.min(x_min.reshape(kg, acc_rows, 128), axis=0)
        rmax = jnp.max(x_max.reshape(kg, acc_rows, 128), axis=0)
        min_ref[...] = rmin.reshape(min_ref.shape)
        max_ref[...] = rmax.reshape(max_ref.shape)

    if needs_mask:
        last = pl.num_programs(0) - 1

        @pl.when(k != last)
        def _():
            x = x_ref[...]
            _emit(x, x)

        @pl.when(k == last)
        def _():
            x = x_ref[...]
            ridx = jax.lax.broadcasted_iota(jnp.int32, x.shape, 0) + k * tile_r
            valid = ridx < r_total
            _emit(jnp.where(valid, x, hi), jnp.where(valid, x, lo))
    else:
        x = x_ref[...]
        _emit(x, x)


def _minmax_c_rows_kernel(x_ref, min_ref, max_ref, *, d_total, tile_d, needs_mask):
    """Corner path ('C', d % 128 != 0): per-row min/max of a (tile_n, tile_d)
    block.  The axis=1 reduce uses the XLU; acceptable for this rare layout."""
    k = pl.program_id(1)
    dt = x_ref.dtype
    hi, lo = _fill_values(dt)
    hi = jnp.asarray(hi, dt)
    lo = jnp.asarray(lo, dt)

    def _update(x_min, x_max):
        rmin = jnp.min(x_min, axis=1, keepdims=True)
        rmax = jnp.max(x_max, axis=1, keepdims=True)
        prev_min = jnp.where(k == 0, hi, min_ref[...])
        prev_max = jnp.where(k == 0, lo, max_ref[...])
        min_ref[...] = jnp.minimum(prev_min, rmin)
        max_ref[...] = jnp.maximum(prev_max, rmax)

    if needs_mask:
        last = pl.num_programs(1) - 1

        @pl.when(k != last)
        def _():
            x = x_ref[...]
            _update(x, x)

        @pl.when(k == last)
        def _():
            x = x_ref[...]
            col = jax.lax.broadcasted_iota(jnp.int32, x.shape, 1) + k * tile_d
            valid = col < d_total
            _update(jnp.where(valid, x, hi), jnp.where(valid, x, lo))
    else:
        x = x_ref[...]
        _update(x, x)


def _minmax_l_rows_kernel(x_ref, min_ref, max_ref, *, d_total, tile_d, needs_mask):
    """Corner path ('L', n*d % 128 != 0): scalar min/max of an (n, tile_d) block
    per step.  Rare layout; keeps a (1,1,1) output slot."""
    k = pl.program_id(0)
    dt = x_ref.dtype
    hi, lo = _fill_values(dt)
    hi = jnp.asarray(hi, dt)
    lo = jnp.asarray(lo, dt)

    def _emit(x_min, x_max):
        min_ref[...] = jnp.min(x_min).reshape(min_ref.shape)
        max_ref[...] = jnp.max(x_max).reshape(max_ref.shape)

    if needs_mask:
        last = pl.num_programs(0) - 1

        @pl.when(k != last)
        def _():
            x = x_ref[...]
            _emit(x, x)

        @pl.when(k == last)
        def _():
            x = x_ref[...]
            col = jax.lax.broadcasted_iota(jnp.int32, x.shape, 1) + k * tile_d
            valid = col < d_total
            _emit(jnp.where(valid, x, hi), jnp.where(valid, x, lo))
    else:
        x = x_ref[...]
        _emit(x, x)


# ---------------------------------------------------------------------------
# Wrapper
# ---------------------------------------------------------------------------
@functools.partial(jax.jit, static_argnames=("q_level", "block_budget_bytes"))
def range_tracker_forward(x, q_level="C", block_budget_bytes=None):
    """Returns (min_val, max_val) with the same shapes as the PyTorch module."""
    n, c, h, w = x.shape
    d = c * h * w
    dtype = x.dtype
    itemsize = jnp.dtype(dtype).itemsize
    sub = _sublanes(dtype)
    budget = _DEFAULT_BLOCK_BUDGET if block_budget_bytes is None else int(block_budget_bytes)
    cost = pl.CostEstimate(flops=2 * x.size, transcendentals=0,
                           bytes_accessed=x.nbytes)

    if q_level == "C":
        if d % 128 == 0:
            g = d // 128
            # Pseudo-row split so the "parallel" i axis has >=2 blocks even for
            # n == 1 (keeps both v7x TensorCores streaming); folded back below.
            p_split = 2 if (n == 1 and g % 2 == 0 and g >= 2 * sub) else 1
            rows = n * p_split
            gp = g // p_split
            xv = x.reshape(rows, gp, 128)

            unit = 128 * itemsize
            g_units = max(sub, (budget // unit) // sub * sub)
            if gp >= sub:
                tile_g = min(g_units, (gp // sub) * sub)   # multiple of sub, <= gp
                acc_rows = sub
            else:
                tile_g = gp                                # tiny row: single step
                acc_rows = gp
            k_steps = _cdiv(gp, tile_g)
            needs_mask = k_steps * tile_g > gp

            rows_per = max(1, budget // (tile_g * unit))
            tile_i = min(rows, rows_per)
            if rows >= 2:
                tile_i = min(tile_i, _cdiv(rows, 2))       # >=2 parallel i-blocks
            i_blocks = _cdiv(rows, tile_i)

            kernel = functools.partial(
                _minmax_c_packed_kernel, acc_rows=acc_rows, g_total=gp,
                tile_g=tile_g, needs_mask=needs_mask)
            block_bytes = tile_i * tile_g * unit
            out_shape = (jax.ShapeDtypeStruct((rows, acc_rows, 128), dtype),) * 2
            min_acc, max_acc = pl.pallas_call(
                kernel,
                out_shape=out_shape,
                grid_spec=pltpu.PrefetchScalarGridSpec(
                    num_scalar_prefetch=0,
                    grid=(i_blocks, k_steps),
                    in_specs=[pl.BlockSpec((tile_i, tile_g, 128),
                                           lambda i, k: (i, k, 0))],
                    out_specs=[pl.BlockSpec((tile_i, acc_rows, 128),
                                            lambda i, k: (i, 0, 0))] * 2),
                compiler_params=pltpu.CompilerParams(
                    dimension_semantics=("parallel", "arbitrary"),
                    vmem_limit_bytes=_vmem_limit(block_bytes)),
                cost_estimate=cost,
            )(xv)
            # Final tiny cross-lane fold on the (rows, acc_rows, 128) slabs.
            min_val = jnp.min(min_acc.reshape(n, -1), axis=1).reshape(n, 1, 1, 1)
            max_val = jnp.max(max_acc.reshape(n, -1), axis=1).reshape(n, 1, 1, 1)
            return min_val, max_val

        # Corner: d not a multiple of 128 -> generic (N, D) row kernel.
        xv = x.reshape(n, d)
        tile_n = n if n <= 8 else 8
        cols = max(128, (budget // (8 * itemsize)) // 128 * 128)
        tile_d = d if d <= cols else cols
        k_steps = _cdiv(d, tile_d)
        needs_mask = k_steps * tile_d > d
        kernel = functools.partial(_minmax_c_rows_kernel, d_total=d,
                                   tile_d=tile_d, needs_mask=needs_mask)
        block_bytes = max(tile_n, 8) * tile_d * itemsize
        out_shape = (jax.ShapeDtypeStruct((n, 1), dtype),) * 2
        min_acc, max_acc = pl.pallas_call(
            kernel,
            out_shape=out_shape,
            grid_spec=pltpu.PrefetchScalarGridSpec(
                num_scalar_prefetch=0,
                grid=(_cdiv(n, tile_n), k_steps),
                in_specs=[pl.BlockSpec((tile_n, tile_d), lambda i, k: (i, k))],
                out_specs=[pl.BlockSpec((tile_n, 1), lambda i, k: (i, 0))] * 2),
            compiler_params=pltpu.CompilerParams(
                dimension_semantics=("parallel", "arbitrary"),
                vmem_limit_bytes=_vmem_limit(block_bytes)),
            cost_estimate=cost,
        )(xv)
        return min_acc.reshape(n, 1, 1, 1), max_acc.reshape(n, 1, 1, 1)

    elif q_level == "L":
        t = n * d
        if t % 128 == 0:
            r = t // 128
            xv = x.reshape(r, 128)
            unit = 128 * itemsize
            r_units = max(sub, (budget // unit) // sub * sub)
            if r >= sub:
                tile_r = min(r_units, (r // sub) * sub)
                acc_rows = sub
                if _cdiv(r, tile_r) < 2 and r >= 2 * sub:
                    # Guarantee >=2 steps on the parallel axis (megacore).
                    tile_r = _round_up(_cdiv(r, 2), sub)
            else:
                tile_r = r
                acc_rows = r
            k_steps = _cdiv(r, tile_r)
            needs_mask = k_steps * tile_r > r
            kernel = functools.partial(_minmax_l_packed_kernel, acc_rows=acc_rows,
                                       r_total=r, tile_r=tile_r,
                                       needs_mask=needs_mask)
            block_bytes = tile_r * unit
            out_shape = (jax.ShapeDtypeStruct((k_steps, acc_rows, 128), dtype),) * 2
            min_p, max_p = pl.pallas_call(
                kernel,
                out_shape=out_shape,
                grid_spec=pltpu.PrefetchScalarGridSpec(
                    num_scalar_prefetch=0,
                    grid=(k_steps,),
                    in_specs=[pl.BlockSpec((tile_r, 128), lambda k: (k, 0))],
                    out_specs=[pl.BlockSpec((1, acc_rows, 128),
                                            lambda k: (k, 0, 0))] * 2),
                compiler_params=pltpu.CompilerParams(
                    dimension_semantics=("parallel",),
                    vmem_limit_bytes=_vmem_limit(block_bytes)),
                cost_estimate=cost,
            )(xv)
            return jnp.min(min_p), jnp.max(max_p)

        # Corner: total element count not a multiple of 128.
        xv = x.reshape(n, d)
        cols = max(128, (budget // (max(_round_up(n, 8), 8) * itemsize)) // 128 * 128)
        tile_d = d if d <= cols else cols
        k_steps = _cdiv(d, tile_d)
        needs_mask = k_steps * tile_d > d
        kernel = functools.partial(_minmax_l_rows_kernel, d_total=d,
                                   tile_d=tile_d, needs_mask=needs_mask)
        block_bytes = _round_up(n, 8) * tile_d * itemsize
        out_shape = (jax.ShapeDtypeStruct((k_steps, 1, 1), dtype),) * 2
        min_p, max_p = pl.pallas_call(
            kernel,
            out_shape=out_shape,
            grid_spec=pltpu.PrefetchScalarGridSpec(
                num_scalar_prefetch=0,
                grid=(k_steps,),
                in_specs=[pl.BlockSpec((n, tile_d), lambda k: (0, k))],
                out_specs=[pl.BlockSpec((1, 1, 1), lambda k: (k, 0, 0))] * 2),
            compiler_params=pltpu.CompilerParams(
                dimension_semantics=("parallel",),
                vmem_limit_bytes=_vmem_limit(block_bytes)),
            cost_estimate=cost,
        )(xv)
        return jnp.min(min_p), jnp.max(max_p)

    else:
        raise ValueError(f"unknown q_level: {q_level}")


class RangeTracker:
    """JAX/Pallas port of the PyTorch RangeTracker base module (forward only)."""

    def __init__(self, q_level):
        self.q_level = q_level

    def update_range(self, min_val, max_val):
        # TODO(synk): abstract in the PyTorch base class (raises NotImplementedError);
        # concrete subclasses (e.g. moving-average trackers) update buffers here.
        raise NotImplementedError

    def forward(self, x):
        min_val, max_val = range_tracker_forward(x, q_level=self.q_level)
        try:
            self.update_range(min_val, max_val)
        except NotImplementedError:
            pass
        return min_val, max_val

    __call__ = forward


if __name__ == "__main__":
    def check(xt, budget=None):
        mn_c, mx_c = range_tracker_forward(xt, q_level="C", block_budget_bytes=budget)
        mn_l, mx_l = range_tracker_forward(xt, q_level="L", block_budget_bytes=budget)
        jax.block_until_ready((mn_c, mx_c, mn_l, mx_l))
        nn = xt.shape[0]
        assert mn_c.shape == (nn, 1, 1, 1) and mx_c.shape == (nn, 1, 1, 1)
        assert jnp.array_equal(mn_c, jnp.min(xt, axis=(1, 2, 3), keepdims=True))
        assert jnp.array_equal(mx_c, jnp.max(xt, axis=(1, 2, 3), keepdims=True))
        assert mn_l.shape == () and mx_l.shape == ()
        assert jnp.array_equal(mn_l, jnp.min(xt)) and jnp.array_equal(mx_l, jnp.max(xt))

    # Primary small example (packed 'C'/'L' paths, >=2 blocks on the parallel axis).
    x = jax.random.normal(jax.random.PRNGKey(0), (2, 4, 16, 16), dtype=jnp.float32)
    mn_c, mx_c = RangeTracker("C").forward(x)
    mn_l, mx_l = RangeTracker("L").forward(x)
    jax.block_until_ready((mn_c, mx_c, mn_l, mx_l))
    assert mn_c.shape == (2, 1, 1, 1) and mx_c.shape == (2, 1, 1, 1)
    assert jnp.array_equal(mn_c, jnp.min(x, axis=(1, 2, 3), keepdims=True))
    assert jnp.array_equal(mx_c, jnp.max(x, axis=(1, 2, 3), keepdims=True))
    assert mn_l.shape == () and mx_l.shape == ()
    assert jnp.array_equal(mn_l, jnp.min(x)) and jnp.array_equal(mx_l, jnp.max(x))

    # Multi-step grids with tail-only masking (tiny forced budget) and a ragged
    # last row-block (default budget: tile_i=2 over n=3).
    x3 = jax.random.normal(jax.random.PRNGKey(1), (3, 3, 24, 16), dtype=jnp.float32)
    check(x3, budget=4096)
    check(x3)

    # n == 1: pseudo-row split keeps both TensorCores busy on the 'C' path.
    x4 = jax.random.normal(jax.random.PRNGKey(2), (1, 4, 32, 16), dtype=jnp.float32)
    check(x4)

    # Corner paths: d and n*d not multiples of 128 (row/scalar fallback kernels).
    x5 = jax.random.normal(jax.random.PRNGKey(3), (2, 3, 10, 10), dtype=jnp.float32)
    check(x5, budget=4096)
    check(x5)

    # dtype-aware sublane tiling (bf16 -> 16-row tiles / accumulators).
    x6 = jax.random.normal(jax.random.PRNGKey(4), (2, 8, 16, 16)).astype(jnp.bfloat16)
    check(x6)

    print("KERNEL_OK")
</pallas_src>

<mosaic_0001>
module attributes {stable_mosaic.version = 11 : i64} {
  func.func @_minmax_c_packed_kernel(%arg0: i32, %arg1: i32, %arg2: memref<1x8x128xf32, #tpu.memory_space<vmem>>, %arg3: memref<1x8x128xf32, #tpu.memory_space<vmem>>, %arg4: memref<1x8x128xf32, #tpu.memory_space<vmem>>) attributes {dimension_semantics = [#tpu.dimension_semantics<parallel>, #tpu.dimension_semantics<arbitrary>], iteration_bounds = array<i64: 2, 1>, scalar_prefetch = 0 : i64, scratch_operands = 0 : i64, tpu.core_type = #tpu.core_type<tc>, window_params = [{transform_indices = @transform_0, window_bounds = array<i64: 1, 8, 128>}, {transform_indices = @transform_1, window_bounds = array<i64: 1, 8, 128>}, {transform_indices = @transform_2, window_bounds = array<i64: 1, 8, 128>}]} {
    %c0 = arith.constant 0 : index
    %c0_0 = arith.constant 0 : index
    %c0_1 = arith.constant 0 : index
    %0 = vector.load %arg2[%c0, %c0_0, %c0_1] : memref<1x8x128xf32, #tpu.memory_space<vmem>>, vector<1x8x128xf32>
    %1 = vector.shape_cast %0 : vector<1x8x128xf32> to vector<1x1x8x128xf32>
    %cst = arith.constant dense<0x7F800000> : vector<1x8x128xf32>
    %2 = vector.multi_reduction <minimumf>, %1, %cst [1] : vector<1x1x8x128xf32> to vector<1x8x128xf32>
    %3 = vector.shape_cast %0 : vector<1x8x128xf32> to vector<1x1x8x128xf32>
    %cst_2 = arith.constant dense<0xFF800000> : vector<1x8x128xf32>
    %4 = vector.multi_reduction <maximumf>, %3, %cst_2 [1] : vector<1x1x8x128xf32> to vector<1x8x128xf32>
    %c0_i32 = arith.constant 0 : i32
    %5 = arith.cmpi eq, %arg1, %c0_i32 : i32
    %c0_3 = arith.constant 0 : index
    %c0_4 = arith.constant 0 : index
    %c0_5 = arith.constant 0 : index
    %6 = vector.load %arg3[%c0_3, %c0_4, %c0_5] : memref<1x8x128xf32, #tpu.memory_space<vmem>>, vector<1x8x128xf32>
    %cst_6 = arith.constant 0x7F800000 : f32
    %7 = vector.broadcast %cst_6 : f32 to vector<1x8x128xf32>
    %8 = arith.select %5, %7, %6 : vector<1x8x128xf32>
    %c0_i32_7 = arith.constant 0 : i32
    %9 = arith.cmpi eq, %arg1, %c0_i32_7 : i32
    %c0_8 = arith.constant 0 : index
    %c0_9 = arith.constant 0 : index
    %c0_10 = arith.constant 0 : index
    %10 = vector.load %arg4[%c0_8, %c0_9, %c0_10] : memref<1x8x128xf32, #tpu.memory_space<vmem>>, vector<1x8x128xf32>
    %cst_11 = arith.constant 0xFF800000 : f32
    %11 = vector.broadcast %cst_11 : f32 to vector<1x8x128xf32>
    %12 = arith.select %9, %11, %10 : vector<1x8x128xf32>
    %13 = arith.minimumf %8, %2 : vector<1x8x128xf32>
    %c0_12 = arith.constant 0 : index
    %c0_13 = arith.constant 0 : index
    %c0_14 = arith.constant 0 : index
    %14 = vector.load %arg3[%c0_12, %c0_13, %c0_14] : memref<1x8x128xf32, #tpu.memory_space<vmem>>, vector<1x8x128xf32>
    tpu.vector_store %arg3[%c0_12, %c0_13, %c0_14], %13 {strides = array<i32>} : memref<1x8x128xf32, #tpu.memory_space<vmem>>, vector<1x8x128xf32>,
    %15 = arith.maximumf %12, %4 : vector<1x8x128xf32>
    %c0_15 = arith.constant 0 : index
    %c0_16 = arith.constant 0 : index
    %c0_17 = arith.constant 0 : index
    %16 = vector.load %arg4[%c0_15, %c0_16, %c0_17] : memref<1x8x128xf32, #tpu.memory_space<vmem>>, vector<1x8x128xf32>
    tpu.vector_store %arg4[%c0_15, %c0_16, %c0_17], %15 {strides = array<i32>} : memref<1x8x128xf32, #tpu.memory_space<vmem>>, vector<1x8x128xf32>,
    return
  }
  func.func @transform_0(%arg0: i32, %arg1: i32) -> (i32, i32, i32) {
    %c0_i32 = arith.constant 0 : i32
    %c0_i32_0 = arith.constant 0 : i32
    return %arg0, %arg1, %c0_i32 : i32, i32, i32
  }
  func.func @transform_1(%arg0: i32, %arg1: i32) -> (i32, i32, i32) {
    %c0_i32 = arith.constant 0 : i32
    %c0_i32_0 = arith.constant 0 : i32
    %c0_i32_1 = arith.constant 0 : i32
    return %arg0, %c0_i32, %c0_i32_0 : i32, i32, i32
  }
  func.func @transform_2(%arg0: i32, %arg1: i32) -> (i32, i32, i32) {
    %c0_i32 = arith.constant 0 : i32
    %c0_i32_0 = arith.constant 0 : i32
    %c0_i32_1 = arith.constant 0 : i32
    return %arg0, %c0_i32, %c0_i32_0 : i32, i32, i32
  }
}

</mosaic_0001>

<bundles_post_ra>
// kernel: range_tracker_forward.1
= control target key start
LH: loop header
LB: loop body
LE: loop exit
PB: predicated region body
PF: predicated region fallthrough
CT: control target
= control target key end

     0   :  { %s354_s9 = smov 0   ;;  %s331_s10 = smov 0   ;;  %s368_s0 = inlined_call_operand.vmem [shape: f32[2,8,128], index: 0, kind: input, shape index: {}]   ;;  %s369_s1 = inlined_call_operand.vmem [shape: f32[2,8,128], index: 1, kind: output, shape index: {0}]   ;;  %s370_s2 = inlined_call_operand.vmem [shape: f32[2,8,128], index: 2, kind: output, shape index: {1}]  }
   0x1   :  { %s335_s11 = smov 0  }
   0x2 LB: > { %s25_s12 = sadd.s32 1, %s333_s10  ;;  %p285_p0 = scmp.ge.s32.totalorder %s337_s11, 1  ;;  %s337_s11 = sphi %s335_s11, %s13_s11   ;;  %s333_s10 = sphi %s331_s10, %s332_s10   ;;  %s329_s9 = sphi %s354_s9, %s371_s9  }
   0x3   : > { %p27_p1 = scmp.ge.s32.totalorder %s25_s12, 2  ;;  %p131_p2 = scmp.lt.s32.totalorder %s337_s11, 3 }
   0x5   : > { %s373_s12 = smov (%p27_p1, %s25_s12), 0  ;;  %p132_p3 = pnand %p285_p0, %p131_p2 }
   0x6   : > { %p158_p4 = scmp.lt.s32.totalorder (!%p132_p3), %s329_s9, 1 }
   0x7   : > { %135 = sbr.rel (%p132_p3) target bundleno = 19 (0x13), region = 24 }
   0xe   : > { %s375_s9 = smov (!%p158_p4, %s329_s9), 1 }
   0xf   : > { %s286_s13 = sshll.u32 %s375_s9, 3 }
  0x10   : > { %s164_s16 = scalar_lea.vmem %s368_s0, %s286_s13  ;;  %s168_s19 = scalar_lea.vmem %s369_s1, %s286_s13 }
  0x11   : > { %v173_v0 = vld [vmem:[%s164_s16] sm:$0xff]  ;;  %s172_s22 = scalar_lea.vmem %s370_s2, %s286_s13 }
  0x12   : > { %183 = vst [vmem:[%s168_s19] sm:$0xff] %v173_v0  ;;  %185 = vst [vmem:[%s172_s22] sm:$0xff] %v173_v0 }
  0x13 PF: > { %s13_s11 = sadd.s32 1, %s337_s11   ;;  %s371_s9 = smov %s333_s10 }
  0x14   : > { %p10_p5 = scmp.ge.s32.totalorder %s13_s11, 4   ;;  %s332_s10 = smov %s373_s12  }
  0x16   :  { %12 = sbr.rel (!%p10_p5) target bundleno = 2 (0x2), region = 66 }

</bundles_post_ra>
